<compile_context>
chip_gen: v6e
topology: v6e:2x2x1
jax: 0.10.0
libtpu: 0.0.40
codegen_flags: <defaults>
</compile_context>

<pallas_src>
import jax
import jax.numpy as jnp
from jax.experimental import pallas as pl
from jax.experimental.pallas import tpu as pltpu

HIDDEN = 30
_SUBLANE = 8


def _round_up(x, m):
    return ((x + m - 1) // m) * m


def _mlp_kernel(x_ref, w1_ref, b1_ref, w2_ref, b2_ref, o_ref):
    # fc1 (MXU, f32 accumulate) + bias + ReLU (VPU)
    x = x_ref[...]
    h = jnp.dot(x, w1_ref[...], preferred_element_type=jnp.float32) + b1_ref[...]
    h = jnp.maximum(h, 0.0)
    # fc2 (MXU, f32 accumulate) + bias; narrow (nb_action-wide) output block
    q = jnp.dot(h, w2_ref[...], preferred_element_type=jnp.float32) + b2_ref[...]
    o_ref[...] = q.astype(o_ref.dtype)


def neural_network_forward(state, w1, b1, w2, b2, *, block_b=8192):
    """ReLU(state @ w1 + b1) @ w2 + b2, as a single fused Pallas kernel.

    state: (B, input_size) ; w1: (input_size, 30) ; b1: (1, 30)
    w2: (30, nb_action)    ; b2: (1, nb_action)   -> (B, nb_action) float32

    `state` is streamed in (tb, input_size) tiles in whatever dtype the caller
    stores it in (pass bf16 to halve the dominant HBM read); no wrapper-side
    pad/cast passes are performed.
    """
    batch, input_size = state.shape
    hidden, nb_action = w2.shape

    # --- batch tiling (no padding: partial last block is masked by Pallas) ---
    tb = min(block_b, _round_up(batch, _SUBLANE))
    # Keep >= 2 (roughly balanced) grid steps on large batches so both v7x
    # TensorCores get work under dimension_semantics=("parallel",).
    if batch >= 2 * _SUBLANE:
        tb = min(tb, _round_up(pl.cdiv(batch, 2), _SUBLANE))
    grid = (pl.cdiv(batch, tb),)

    def resident(a):  # weights/biases: same block every grid step -> no re-DMA
        return pl.BlockSpec(a.shape, lambda i: (0, 0))

    flops = 2 * batch * (input_size * hidden + hidden * nb_action)
    bytes_accessed = (state.size * state.dtype.itemsize
                      + w1.size * w1.dtype.itemsize
                      + w2.size * w2.dtype.itemsize
                      + b1.size * b1.dtype.itemsize
                      + b2.size * b2.dtype.itemsize
                      + batch * nb_action * 4)

    return pl.pallas_call(
        _mlp_kernel,
        out_shape=jax.ShapeDtypeStruct((batch, nb_action), jnp.float32),
        grid=grid,
        in_specs=[
            pl.BlockSpec((tb, input_size), lambda i: (i, 0)),  # streamed states
            resident(w1), resident(b1), resident(w2), resident(b2),
        ],
        out_specs=pl.BlockSpec((tb, nb_action), lambda i: (i, 0)),
        compiler_params=pltpu.CompilerParams(
            dimension_semantics=("parallel",)),  # shard batch grid on v7x's 2 TCs
        cost_estimate=pl.CostEstimate(flops=flops, transcendentals=0,
                                      bytes_accessed=bytes_accessed),
    )(state, w1, b1, w2, b2)


def init_params(key, input_size, nb_action, hidden=HIDDEN):
    """Init mirroring torch.nn.Linear (uniform +-1/sqrt(fan_in)), stored (in, out)."""
    k1, k2, k3, k4 = jax.random.split(key, 4)
    bound1 = 1.0 / jnp.sqrt(jnp.float32(input_size))
    bound2 = 1.0 / jnp.sqrt(jnp.float32(hidden))
    w1 = jax.random.uniform(k1, (input_size, hidden), jnp.float32, -bound1, bound1)
    b1 = jax.random.uniform(k2, (1, hidden), jnp.float32, -bound1, bound1)
    w2 = jax.random.uniform(k3, (hidden, nb_action), jnp.float32, -bound2, bound2)
    b2 = jax.random.uniform(k4, (1, nb_action), jnp.float32, -bound2, bound2)
    return w1, b1, w2, b2


def _ref_forward(state, w1, b1, w2, b2):
    return jnp.maximum(state @ w1 + b1, 0.0) @ w2 + b2


if __name__ == "__main__":
    # car/ai.py is typically used with input_size=5, nb_action=3.
    input_size, nb_action = 5, 3
    key = jax.random.PRNGKey(0)
    kx, kb, kp = jax.random.split(key, 3)
    w1, b1, w2, b2 = init_params(kp, input_size, nb_action)

    # --- small single-state style call (B=2, single partial block), f32 ----
    state_small = jax.random.normal(kx, (2, input_size), jnp.float32)
    q_small = jax.block_until_ready(
        neural_network_forward(state_small, w1, b1, w2, b2))
    ref_small = _ref_forward(state_small, w1, b1, w2, b2)
    assert q_small.shape == (2, nb_action)
    assert jnp.allclose(q_small, ref_small, atol=1e-5, rtol=1e-5)

    # --- large replay-buffer style batch: 2-way split + partial last block -
    big_b = 4001  # odd -> exercises the masked partial final block
    state_big = jax.random.normal(kb, (big_b, input_size), jnp.float32)
    q_big = jax.block_until_ready(
        neural_network_forward(state_big, w1, b1, w2, b2))
    ref_big = _ref_forward(state_big, w1, b1, w2, b2)
    assert q_big.shape == (big_b, nb_action)
    assert jnp.allclose(q_big, ref_big, atol=1e-4, rtol=1e-4)

    # --- multi-step grid path (smaller tile override) ----------------------
    q_multi = jax.block_until_ready(
        neural_network_forward(state_big, w1, b1, w2, b2, block_b=512))
    assert jnp.allclose(q_multi, ref_big, atol=1e-4, rtol=1e-4)

    # --- caller-stored bf16 state (halves the dominant HBM read) -----------
    q_bf16 = jax.block_until_ready(
        neural_network_forward(state_big.astype(jnp.bfloat16), w1, b1, w2, b2))
    assert q_bf16.shape == (big_b, nb_action)
    assert jnp.allclose(q_bf16, ref_big, atol=5e-2, rtol=5e-2)

    print("KERNEL_OK")
</pallas_src>

<mosaic_0001>
module attributes {stable_mosaic.version = 11 : i64} {
  func.func @_mlp_kernel(%arg0: i32, %arg1: memref<8x5xf32, #tpu.memory_space<vmem>>, %arg2: memref<5x30xf32, #tpu.memory_space<vmem>>, %arg3: memref<1x30xf32, #tpu.memory_space<vmem>>, %arg4: memref<30x3xf32, #tpu.memory_space<vmem>>, %arg5: memref<1x3xf32, #tpu.memory_space<vmem>>, %arg6: memref<8x3xf32, #tpu.memory_space<vmem>>) attributes {dimension_semantics = [#tpu.dimension_semantics<parallel>], iteration_bounds = array<i64: 1>, scalar_prefetch = 0 : i64, scratch_operands = 0 : i64, tpu.core_type = #tpu.core_type<tc>, window_params = [{transform_indices = @transform_0, window_bounds = array<i64: 8, 5>}, {pipeline_mode = #tpu.pipeline_mode<synchronous>, transform_indices = @transform_1, window_bounds = array<i64: 5, 30>}, {pipeline_mode = #tpu.pipeline_mode<synchronous>, transform_indices = @transform_2, window_bounds = array<i64: 1, 30>}, {pipeline_mode = #tpu.pipeline_mode<synchronous>, transform_indices = @transform_3, window_bounds = array<i64: 30, 3>}, {pipeline_mode = #tpu.pipeline_mode<synchronous>, transform_indices = @transform_4, window_bounds = array<i64: 1, 3>}, {transform_indices = @transform_5, window_bounds = array<i64: 8, 3>}]} {
    %c0 = arith.constant 0 : index
    %c0_0 = arith.constant 0 : index
    %0 = vector.load %arg1[%c0, %c0_0] : memref<8x5xf32, #tpu.memory_space<vmem>>, vector<8x5xf32>
    %c0_1 = arith.constant 0 : index
    %c0_2 = arith.constant 0 : index
    %1 = vector.load %arg2[%c0_1, %c0_2] : memref<5x30xf32, #tpu.memory_space<vmem>>, vector<5x30xf32>
    %cst = arith.constant dense<0.000000e+00> : vector<8x30xf32>
    %2 = tpu.matmul %0, %1, %cst {dimension_numbers = #tpu.dot_dimension_numbers<[1], [0], [0], [1], [0, 0, 1, 1], [], []>} : vector<8x5xf32>, vector<5x30xf32>, vector<8x30xf32> -> vector<8x30xf32>
    %c0_3 = arith.constant 0 : index
    %c0_4 = arith.constant 0 : index
    %3 = vector.load %arg3[%c0_3, %c0_4] : memref<1x30xf32, #tpu.memory_space<vmem>>, vector<1x30xf32>
    %4 = vector.broadcast %3 : vector<1x30xf32> to vector<8x30xf32>
    %5 = arith.addf %2, %4 : vector<8x30xf32>
    %cst_5 = arith.constant 0.000000e+00 : f32
    %6 = vector.broadcast %cst_5 : f32 to vector<8x30xf32>
    %7 = arith.maximumf %5, %6 : vector<8x30xf32>
    %c0_6 = arith.constant 0 : index
    %c0_7 = arith.constant 0 : index
    %8 = vector.load %arg4[%c0_6, %c0_7] : memref<30x3xf32, #tpu.memory_space<vmem>>, vector<30x3xf32>
    %cst_8 = arith.constant dense<0.000000e+00> : vector<8x3xf32>
    %9 = tpu.matmul %7, %8, %cst_8 {dimension_numbers = #tpu.dot_dimension_numbers<[1], [0], [0], [1], [0, 0, 1, 1], [], []>} : vector<8x30xf32>, vector<30x3xf32>, vector<8x3xf32> -> vector<8x3xf32>
    %c0_9 = arith.constant 0 : index
    %c0_10 = arith.constant 0 : index
    %10 = vector.load %arg5[%c0_9, %c0_10] : memref<1x3xf32, #tpu.memory_space<vmem>>, vector<1x3xf32>
    %11 = vector.broadcast %10 : vector<1x3xf32> to vector<8x3xf32>
    %12 = arith.addf %9, %11 : vector<8x3xf32>
    %c0_11 = arith.constant 0 : index
    %c0_12 = arith.constant 0 : index
    %13 = vector.load %arg6[%c0_11, %c0_12] : memref<8x3xf32, #tpu.memory_space<vmem>>, vector<8x3xf32>
    tpu.vector_store %arg6[%c0_11, %c0_12], %12 {strides = array<i32>} : memref<8x3xf32, #tpu.memory_space<vmem>>, vector<8x3xf32>,
    return
  }
  func.func @transform_0(%arg0: i32) -> (i32, i32) {
    %c0_i32 = arith.constant 0 : i32
    %c0_i32_0 = arith.constant 0 : i32
    return %arg0, %c0_i32 : i32, i32
  }
  func.func @transform_1(%arg0: i32) -> (i32, i32) {
    %c0_i32 = arith.constant 0 : i32
    %c0_i32_0 = arith.constant 0 : i32
    %c0_i32_1 = arith.constant 0 : i32
    return %c0_i32, %c0_i32_0 : i32, i32
  }
  func.func @transform_2(%arg0: i32) -> (i32, i32) {
    %c0_i32 = arith.constant 0 : i32
    %c0_i32_0 = arith.constant 0 : i32
    %c0_i32_1 = arith.constant 0 : i32
    return %c0_i32, %c0_i32_0 : i32, i32
  }
  func.func @transform_3(%arg0: i32) -> (i32, i32) {
    %c0_i32 = arith.constant 0 : i32
    %c0_i32_0 = arith.constant 0 : i32
    %c0_i32_1 = arith.constant 0 : i32
    return %c0_i32, %c0_i32_0 : i32, i32
  }
  func.func @transform_4(%arg0: i32) -> (i32, i32) {
    %c0_i32 = arith.constant 0 : i32
    %c0_i32_0 = arith.constant 0 : i32
    %c0_i32_1 = arith.constant 0 : i32
    return %c0_i32, %c0_i32_0 : i32, i32
  }
  func.func @transform_5(%arg0: i32) -> (i32, i32) {
    %c0_i32 = arith.constant 0 : i32
    %c0_i32_0 = arith.constant 0 : i32
    return %arg0, %c0_i32 : i32, i32
  }
}

</mosaic_0001>

<bundles_post_ra>
// kernel: tpu_custom_call.1
= control target key start
LH: loop header
LB: loop body
LE: loop exit
PB: predicated region body
PF: predicated region fallthrough
CT: control target
= control target key end

     0   :  { %10 = vsyncpa [#allocation3], 0  ;;  %vm34_vm0 = vcmask 1044480   ;;  %v272_v1 = vmov 0.0   ;;  %vm30_vm1 = vcmask 39936   ;;  %vm124_vm2 = vcmask 1045504   ;;  %s334_s0 = inlined_call_operand.vmem [shape: f32[2,5], index: 0, kind: input, shape index: {}]   ;;  %s335_s1 = inlined_call_operand.vmem [shape: f32[5,30], index: 1, kind: input, shape index: {}]   ;;  %s336_s2 = inlined_call_operand.vmem [shape: f32[1,30], index: 2, kind: input, shape index: {}]   ;;  %s337_s3 = inlined_call_operand.vmem [shape: f32[30,3], index: 3, kind: input, shape index: {}]   ;;  %s338_s4 = inlined_call_operand.vmem [shape: f32[1,3], index: 4, kind: input, shape index: {}]   ;;  %s339_s5 = inlined_call_operand.hbm [shape: f32[2,3], index: 5, kind: output, shape index: {}]  }
   0x1   :  { %v22_v0 = vld [vmem:[%s335_s1] sm:$0x1f]  ;;  %229 = vmatprep.subr.mxu0 %v272_v1  ;;  %234 = vmatprep.subr.mxu1 %v272_v1  ;;  %v112_v3 = vld [vmem:[%s337_s3 + $0x18] sm:$0x3f]  ;;  %vm273_vm3 = vmmov 0   ;;  %v111_v4 = vld [vmem:[%s337_s3 + $0x10] sm:$0xff] }
   0x2   :  { %v21_v2 = vld [vmem:[%s334_s0] sm:$0xff]  ;;  %230 = vmatpush3.msk.msra.mxu0 %vm34_vm0, %v22_v0  ;;  %231 = vmatprep.mubr.msk.f32.mxu0 %vm273_vm3, %v272_v1  ;;  %v110_v5 = vld [vmem:[%s337_s3 + $0x8] sm:$0xff]  ;;  %vm120_vm4 = vcmask 244736   ;;  %vm198_vm5 = vcmask 23552  }
   0x3   :  { %232 = vmatmul.mubr.msk.f32.vlgmr.msra.gmra.mxu0 %vm30_vm1, %v21_v2  ;;  %235 = vmatpush3.msk.msra.mxu1 %vm124_vm2, %v112_v3  ;;  %v109_v6 = vld [vmem:[%s337_s3] sm:$0xff] }
   0x4   :  { %236 = vmatprep.subr.mxu1 %v272_v1  ;;  %242 = vmatprep.mubr.msk.f32.mxu1 %vm273_vm3, %v272_v1  ;;  %v216_v7 = vld [vmem:[%s336_s2] ss:$0 sm:$0xff] }
   0x5   :  { %237 = vmatpush3.msra.mxu1 %v111_v4  ;;  %v219_v12 = vld [vmem:[%s338_s4] ss:$0 sm:$0xff] }
   0x6   :  { %238 = vmatprep.subr.mxu1 %v272_v1 }
   0x7   :  { %239 = vmatpush3.msra.mxu1 %v110_v5 }
   0x8   :  { %240 = vmatprep.subr.mxu1 %v272_v1 }
   0x9   :  { %241 = vmatpush3.msra.mxu1 %v109_v6 }
  0xc3   :  { %v104_v8 = vpop.f32.mrf.mxu0 }
  0xc4   :  { %v105_v9 = vadd.f32 %v216_v7, %v104_v8 }
  0xc5   :  { %v233_v10 = vpop.f32.mrf.mxu0 }
  0xc6   :  { %v108_v11 = vmax.f32 %v105_v9, 0.0 }
  0xc8   :  { %243 = vmatmul.mubr.msk.f32.vlgmr.msra.gmra.mxu1 %vm120_vm4, %v108_v11 }
 0x188   :  { %v194_v13 = vpop.f32.mrf.mxu1 }
 0x189   :  { %v195_v14 = vadd.f32 %v219_v12, %v194_v13 }
 0x18a   :  { %v244_v15 = vpop.f32.mrf.mxu1 }
 0x18b   :  { %199 = vst.msk [vmem:[#allocation2] sm:$0xff] %vm198_vm5, %v195_v14 }
 0x18c   :  { %204 = vsyncadd [#allocation3], 96  ;;  %s274_s3 = smov [#allocation2]  }
 0x18d   :  { %s205_s7 = sshll.u32 %s274_s3, 4  ;;  %s206_s7 = int_to_ptr.vmem [resolvable:$true] %s205_s7 }
 0x18e   :  { %s250_s2 = scalar_lea.vmem %s206_s7, 32  ;;  %s254_s8 = scalar_lea.vmem %s206_s7, 128 }
 0x18f   :  { %p251_p0 = scmp.ne.s32.totalorder %s206_s7, %s250_s2  ;;  %p255_p1 = scmp.lt.s32.totalorder %s206_s7, %s206_s7 }
 0x190   :  { %p256_p2 = scmp.lt.s32.totalorder %s254_s8, %s250_s2 }
 0x192   :  { %p257_p3 = por %p256_p2, %p255_p1 }
 0x194   :  { %p258_p4 = pnand %p257_p3, %p251_p0 }
 0x196   :  { %261 = shalt.err (!%p258_p4)
}
 0x197   :  { %s275_s9 = smov 32   ;;  %s276_s10 = smov 2  }
 0x198   :  { %211 = dma.vmem_to_hbm [thread:$0]  %s206_s7, 32, %s339_s5, [#allocation3], %s275_s9, %s275_s9, %s276_s10  }
 0x199   :  { %270 = dma.done.wait [#allocation3], 128  }
 0x19a   :  { %271 = vsyncadd [#allocation3], 4294967168 }
 0x19b   :  { %215 = vsyncpa [#allocation3], 1 }

</bundles_post_ra>
